<compile_context>
chip_gen: v6e
topology: v6e:2x2x1
jax: 0.10.0
libtpu: 0.0.40
codegen_flags: <defaults>
</compile_context>

<pallas_src>
import math

import jax
import jax.numpy as jnp
from jax.experimental import pallas as pl
from jax.experimental.pallas import tpu as pltpu


# ----------------------------------------------------------------------------
# Kernel
# ----------------------------------------------------------------------------
def relationv2_kernel(ft_ref, nb_ref, wft_ref, wnb_ref, r_ref, ones_ref,
                      out_ref):
    """One row-tile of the packed Relationv2 forward.

    Each ref row holds `pack` original nodes side by side along lanes:
      ft/nb/out : (tile, W)     W = pack * Fin (128 in the packed path)
      wft/wnb   : (W, 2*W)      block-diagonal folded weights; output lanes
                                [0:W] are gamma pre-act, [W:2W] are beta.
      r         : (1, W)        r tiled `pack` times along lanes.
      ones      : (W, W)        block-diagonal ones (per-node sum matrix).
    """
    ft = ft_ref[...]                         # (tile, W) f32
    nb = nb_ref[...]                         # (tile, W) f32
    w = ft.shape[-1]

    # Fused gamma|beta pre-activation.  f32 MXU matmuls: the kernel is
    # HBM-bound, so the extra f32 passes are hidden and precision is free.
    gb = jnp.dot(ft, wft_ref[...], preferred_element_type=jnp.float32)
    gb = gb + jnp.dot(nb, wnb_ref[...], preferred_element_type=jnp.float32)

    act = jnp.where(gb > 0.0, gb, 0.2 * gb)  # LeakyReLU(0.2)
    gamma = act[:, :w] + 1.0                 # split lands on a vreg boundary
    beta = act[:, w:]

    m = ft + gamma * r_ref[...] + beta - nb

    # Per-node sum of squares: the block-diagonal ones matmul sums m*m over
    # each node's own Fin lanes and broadcasts it back onto those lanes —
    # no cross-lane VPU/XLU reduction needed.
    ss = jnp.dot(m * m, ones_ref[...], preferred_element_type=jnp.float32)
    # F.normalize: m / max(||m||, 1e-12) == m * rsqrt(max(||m||^2, 1e-24)).
    # Garbage rows of a ragged last block may hit the clamp and emit zeros,
    # but their writes are masked away by Pallas, so they never reach HBM.
    inv = jax.lax.rsqrt(jnp.maximum(ss, 1e-24))   # EUP rsqrt (free slot)
    out_ref[...] = (m * inv).astype(out_ref.dtype)


# ----------------------------------------------------------------------------
# Wrapper helpers
# ----------------------------------------------------------------------------
def choose_pack(n_nodes, in_features):
    """How many node rows to pack side by side into one 128-lane vreg row."""
    if in_features >= 128 or 128 % in_features != 0:
        return 1
    pack = 128 // in_features
    while pack > 1 and n_nodes % pack != 0:
        pack //= 2
    return max(pack, 1)


def prepare_relation_params(params, pack):
    """Fold the two-Linear chains and lay them out block-diagonally.

    Runs ONCE per parameter update (hoisted out of the forward call).
    x @ W1^T @ W2^T == x @ (W1^T @ W2^T), so each gamma/beta branch folds to a
    single (Fin, Fin) matrix; `pack` copies are placed block-diagonally so one
    lane-dense matmul handles all packed nodes at once.
    """
    fin = params["r"].shape[1]
    fold = lambda w1, w2: w1.T @ w2.T                       # (Fin, Fin)
    wg_ft = fold(params["gamma1_1"], params["gamma1_2"])
    wg_nb = fold(params["gamma2_1"], params["gamma2_2"])
    wb_ft = fold(params["beta1_1"], params["beta1_2"])
    wb_nb = fold(params["beta2_1"], params["beta2_2"])

    w_lane = pack * fin

    def block_layout(wg, wb):
        # Output lanes [0:W] = gamma pre-act of every packed node,
        # lanes [W:2W] = beta pre-act, so the kernel split is vreg-aligned.
        out = jnp.zeros((w_lane, 2 * w_lane), dtype=jnp.float32)
        for i in range(pack):
            r0 = i * fin
            out = out.at[r0:r0 + fin, r0:r0 + fin].set(wg)
            out = out.at[r0:r0 + fin, w_lane + r0:w_lane + r0 + fin].set(wb)
        return out

    w_ft = block_layout(wg_ft, wb_ft)
    w_nb = block_layout(wg_nb, wb_nb)
    r_tiled = jnp.tile(params["r"].astype(jnp.float32), (1, pack))
    ones_blk = jnp.kron(jnp.eye(pack, dtype=jnp.float32),
                        jnp.ones((fin, fin), dtype=jnp.float32))
    return w_ft, w_nb, r_tiled, ones_blk


def _choose_tile(n_rows, requested, width):
    """Row tile: big (amortize ~0.35us/step), multiple of 8, VMEM-guarded,
    and capped so the grid has >=2 steps (v7x two-TensorCore sharding)."""
    if n_rows <= 8:
        return n_rows                                  # single full-extent block
    tile = max(8, min(requested, n_rows))
    tile = ((tile + 7) // 8) * 8                       # sublane multiple, always
    # VMEM guard (v5e: 16 MiB default scoped VMEM). Budget ~12 stream-sized
    # live buffers per step (3 streams double-buffered + matmul/epilogue temps).
    budget = 12 * 1024 * 1024
    vmem_cap = max(8, (budget // (12 * width * 4)) // 8 * 8)
    tile = min(tile, vmem_cap)
    # Keep >=2 grid iterations so dimension_semantics=("parallel",) lets v7x
    # use both TensorCores (no-op on v5e/v6e).
    half = ((((n_rows + 1) // 2) + 7) // 8) * 8
    tile = min(tile, max(8, half))
    return tile


def relationv2_forward(ft, neighbor, prepared, *, tile_rows=2048):
    """Relationv2 (ablation=0) forward.  ft/neighbor: (N, Fin) float32."""
    w_ft, w_nb, r_tiled, ones_blk = prepared
    n, fin = ft.shape
    w_lane = w_ft.shape[0]
    pack = w_lane // fin
    assert n % pack == 0, "pack (from choose_pack) must divide N"
    n_rows = n // pack

    # Lane packing: for row-major data this reshape is a flat re-view (same
    # memory order) — `pack` consecutive nodes share one 128-lane vreg row.
    ft_p = ft.reshape(n_rows, w_lane)
    nb_p = neighbor.reshape(n_rows, w_lane)

    tile = _choose_tile(n_rows, tile_rows, w_lane)
    grid = (pl.cdiv(n_rows, tile),)   # no pad: ragged last block -> masked writes

    row_spec = pl.BlockSpec((tile, w_lane), lambda i: (i, 0))
    w_spec = pl.BlockSpec((w_lane, 2 * w_lane), lambda i: (0, 0))  # VMEM-resident
    r_spec = pl.BlockSpec((1, w_lane), lambda i: (0, 0))
    ones_spec = pl.BlockSpec((w_lane, w_lane), lambda i: (0, 0))

    cost = pl.CostEstimate(
        flops=int(10 * n_rows * w_lane * w_lane + 8 * n_rows * w_lane),
        transcendentals=int(n_rows * w_lane),
        bytes_accessed=int(3 * n_rows * w_lane * 4
                           + (5 * w_lane * w_lane + w_lane) * 4),
    )

    out = pl.pallas_call(
        relationv2_kernel,
        out_shape=jax.ShapeDtypeStruct((n_rows, w_lane), ft.dtype),
        grid=grid,
        in_specs=[row_spec, row_spec, w_spec, w_spec, r_spec, ones_spec],
        out_specs=row_spec,
        compiler_params=pltpu.CompilerParams(
            dimension_semantics=("parallel",)),
        cost_estimate=cost,
    )(ft_p, nb_p, w_ft, w_nb, r_tiled, ones_blk)

    return out.reshape(n, fin)


# ----------------------------------------------------------------------------
# Synthetic params + pure-JAX reference (for verification)
# ----------------------------------------------------------------------------
def init_params(key, in_features, out_features):
    """Deterministic synthetic init matching the PyTorch module's shapes.

    nn.Linear(in, out, bias=False) stores weight of shape (out, in).
    r is (1, in_features), uniform(-stdv, stdv), stdv = 1/sqrt(in_features).
    """
    names_oi = ["gamma1_1", "gamma2_1", "beta1_1", "beta2_1"]   # (out, in)
    names_io = ["gamma1_2", "gamma2_2", "beta1_2", "beta2_2"]   # (in, out)
    keys = jax.random.split(key, len(names_oi) + len(names_io) + 1)
    k_iter = iter(keys)
    params = {}
    bound1 = 1.0 / math.sqrt(in_features)
    for nm in names_oi:
        params[nm] = jax.random.uniform(
            next(k_iter), (out_features, in_features),
            minval=-bound1, maxval=bound1, dtype=jnp.float32)
    bound2 = 1.0 / math.sqrt(out_features)
    for nm in names_io:
        params[nm] = jax.random.uniform(
            next(k_iter), (in_features, out_features),
            minval=-bound2, maxval=bound2, dtype=jnp.float32)
    stdv = 1.0 / math.sqrt(in_features)
    params["r"] = jax.random.uniform(
        next(k_iter), (1, in_features), minval=-stdv, maxval=stdv,
        dtype=jnp.float32)
    return params


def relationv2_ref(ft, neighbor, params):
    """Pure-JAX f32 reference mirroring the PyTorch forward (ablation=0)."""
    lin = lambda x, w: x @ w.T
    g1 = lin(lin(ft, params["gamma1_1"]), params["gamma1_2"])
    g2 = lin(lin(neighbor, params["gamma2_1"]), params["gamma2_2"])
    gamma = jnp.where(g1 + g2 > 0, g1 + g2, 0.2 * (g1 + g2)) + 1.0
    b1 = lin(lin(ft, params["beta1_1"]), params["beta1_2"])
    b2 = lin(lin(neighbor, params["beta2_1"]), params["beta2_2"])
    beta = jnp.where(b1 + b2 > 0, b1 + b2, 0.2 * (b1 + b2))
    r_v = gamma * params["r"] + beta
    m = ft + r_v - neighbor
    norm = jnp.maximum(jnp.sqrt(jnp.sum(m * m, axis=-1, keepdims=True)), 1e-12)
    return m / norm


if __name__ == "__main__":
    in_features = 32
    out_features = 16
    key = jax.random.PRNGKey(0)
    k_ft, k_nb, k_p = jax.random.split(key, 3)
    params = init_params(k_p, in_features, out_features)

    # --- main check: N divisible by the pack factor (lane-dense fast path) ---
    N = 128
    ft = jax.random.normal(k_ft, (N, in_features), dtype=jnp.float32)
    neighbor = jax.random.normal(k_nb, (N, in_features), dtype=jnp.float32)

    pack = choose_pack(N, in_features)
    prepared = prepare_relation_params(params, pack)   # hoisted, once per update

    out = relationv2_forward(ft, neighbor, prepared)
    out = jax.block_until_ready(out)

    ref = relationv2_ref(ft, neighbor, params)
    assert out.shape == (N, in_features)
    assert jnp.allclose(out, ref, atol=1e-2, rtol=1e-2), "mismatch vs reference"

    # --- ragged check: last row-block does not fill the tile (masked writes) ---
    N2 = 100
    ft2 = jax.random.normal(k_ft, (N2, in_features), dtype=jnp.float32)
    nb2 = jax.random.normal(k_nb, (N2, in_features), dtype=jnp.float32)
    pack2 = choose_pack(N2, in_features)
    prepared2 = prepare_relation_params(params, pack2)
    out2 = jax.block_until_ready(relationv2_forward(ft2, nb2, prepared2))
    ref2 = relationv2_ref(ft2, nb2, params)
    assert out2.shape == (N2, in_features)
    assert jnp.allclose(out2, ref2, atol=1e-2, rtol=1e-2), "ragged mismatch"

    print("KERNEL_OK")
</pallas_src>

<mosaic_0001>
module attributes {stable_mosaic.version = 11 : i64} {
  func.func @relationv2_kernel(%arg0: i32, %arg1: memref<16x128xf32, #tpu.memory_space<vmem>>, %arg2: memref<16x128xf32, #tpu.memory_space<vmem>>, %arg3: memref<128x256xf32, #tpu.memory_space<vmem>>, %arg4: memref<128x256xf32, #tpu.memory_space<vmem>>, %arg5: memref<1x128xf32, #tpu.memory_space<vmem>>, %arg6: memref<128x128xf32, #tpu.memory_space<vmem>>, %arg7: memref<16x128xf32, #tpu.memory_space<vmem>>) attributes {dimension_semantics = [#tpu.dimension_semantics<parallel>], iteration_bounds = array<i64: 2>, scalar_prefetch = 0 : i64, scratch_operands = 0 : i64, tpu.core_type = #tpu.core_type<tc>, window_params = [{transform_indices = @transform_0, window_bounds = array<i64: 16, 128>}, {transform_indices = @transform_1, window_bounds = array<i64: 16, 128>}, {pipeline_mode = #tpu.pipeline_mode<synchronous>, transform_indices = @transform_2, window_bounds = array<i64: 128, 256>}, {pipeline_mode = #tpu.pipeline_mode<synchronous>, transform_indices = @transform_3, window_bounds = array<i64: 128, 256>}, {pipeline_mode = #tpu.pipeline_mode<synchronous>, transform_indices = @transform_4, window_bounds = array<i64: 1, 128>}, {pipeline_mode = #tpu.pipeline_mode<synchronous>, transform_indices = @transform_5, window_bounds = array<i64: 128, 128>}, {transform_indices = @transform_6, window_bounds = array<i64: 16, 128>}]} {
    %c0 = arith.constant 0 : index
    %c0_0 = arith.constant 0 : index
    %0 = vector.load %arg1[%c0, %c0_0] : memref<16x128xf32, #tpu.memory_space<vmem>>, vector<16x128xf32>
    %c0_1 = arith.constant 0 : index
    %c0_2 = arith.constant 0 : index
    %1 = vector.load %arg2[%c0_1, %c0_2] : memref<16x128xf32, #tpu.memory_space<vmem>>, vector<16x128xf32>
    %c0_3 = arith.constant 0 : index
    %c0_4 = arith.constant 0 : index
    %2 = vector.load %arg3[%c0_3, %c0_4] : memref<128x256xf32, #tpu.memory_space<vmem>>, vector<128x256xf32>
    %cst = arith.constant dense<0.000000e+00> : vector<16x256xf32>
    %3 = tpu.matmul %0, %2, %cst {dimension_numbers = #tpu.dot_dimension_numbers<[1], [0], [0], [1], [0, 0, 1, 1], [], []>} : vector<16x128xf32>, vector<128x256xf32>, vector<16x256xf32> -> vector<16x256xf32>
    %c0_5 = arith.constant 0 : index
    %c0_6 = arith.constant 0 : index
    %4 = vector.load %arg4[%c0_5, %c0_6] : memref<128x256xf32, #tpu.memory_space<vmem>>, vector<128x256xf32>
    %cst_7 = arith.constant dense<0.000000e+00> : vector<16x256xf32>
    %5 = tpu.matmul %1, %4, %cst_7 {dimension_numbers = #tpu.dot_dimension_numbers<[1], [0], [0], [1], [0, 0, 1, 1], [], []>} : vector<16x128xf32>, vector<128x256xf32>, vector<16x256xf32> -> vector<16x256xf32>
    %6 = arith.addf %3, %5 : vector<16x256xf32>
    %cst_8 = arith.constant 0.000000e+00 : f32
    %7 = vector.broadcast %cst_8 : f32 to vector<16x256xf32>
    %8 = arith.cmpf ogt, %6, %7 : vector<16x256xf32>
    %cst_9 = arith.constant 2.000000e-01 : f32
    %9 = vector.broadcast %cst_9 : f32 to vector<16x256xf32>
    %10 = arith.mulf %9, %6 : vector<16x256xf32>
    %11 = arith.select %8, %6, %10 : vector<16x256xi1>, vector<16x256xf32>
    %12 = vector.extract_strided_slice %11 {offsets = [0, 0], sizes = [16, 128], strides = [1, 1]} : vector<16x256xf32> to vector<16x128xf32>
    %cst_10 = arith.constant 1.000000e+00 : f32
    %13 = vector.broadcast %cst_10 : f32 to vector<16x128xf32>
    %14 = arith.addf %12, %13 : vector<16x128xf32>
    %15 = vector.extract_strided_slice %11 {offsets = [0, 128], sizes = [16, 128], strides = [1, 1]} : vector<16x256xf32> to vector<16x128xf32>
    %c0_11 = arith.constant 0 : index
    %c0_12 = arith.constant 0 : index
    %16 = vector.load %arg5[%c0_11, %c0_12] : memref<1x128xf32, #tpu.memory_space<vmem>>, vector<1x128xf32>
    %17 = vector.broadcast %16 : vector<1x128xf32> to vector<16x128xf32>
    %18 = arith.mulf %14, %17 : vector<16x128xf32>
    %19 = arith.addf %0, %18 : vector<16x128xf32>
    %20 = arith.addf %19, %15 : vector<16x128xf32>
    %21 = arith.subf %20, %1 : vector<16x128xf32>
    %22 = arith.mulf %21, %21 : vector<16x128xf32>
    %c0_13 = arith.constant 0 : index
    %c0_14 = arith.constant 0 : index
    %23 = vector.load %arg6[%c0_13, %c0_14] : memref<128x128xf32, #tpu.memory_space<vmem>>, vector<128x128xf32>
    %cst_15 = arith.constant dense<0.000000e+00> : vector<16x128xf32>
    %24 = tpu.matmul %22, %23, %cst_15 {dimension_numbers = #tpu.dot_dimension_numbers<[1], [0], [0], [1], [0, 0, 1, 1], [], []>} : vector<16x128xf32>, vector<128x128xf32>, vector<16x128xf32> -> vector<16x128xf32>
    %cst_16 = arith.constant 1.000000e-24 : f32
    %25 = vector.broadcast %cst_16 : f32 to vector<16x128xf32>
    %26 = arith.maximumf %24, %25 : vector<16x128xf32>
    %27 = math.rsqrt %26 : vector<16x128xf32>
    %28 = arith.mulf %21, %27 : vector<16x128xf32>
    %c0_17 = arith.constant 0 : index
    %c0_18 = arith.constant 0 : index
    %29 = vector.load %arg7[%c0_17, %c0_18] : memref<16x128xf32, #tpu.memory_space<vmem>>, vector<16x128xf32>
    tpu.vector_store %arg7[%c0_17, %c0_18], %28 {strides = array<i32>} : memref<16x128xf32, #tpu.memory_space<vmem>>, vector<16x128xf32>,
    return
  }
  func.func @transform_0(%arg0: i32) -> (i32, i32) {
    %c0_i32 = arith.constant 0 : i32
    %c0_i32_0 = arith.constant 0 : i32
    return %arg0, %c0_i32 : i32, i32
  }
  func.func @transform_1(%arg0: i32) -> (i32, i32) {
    %c0_i32 = arith.constant 0 : i32
    %c0_i32_0 = arith.constant 0 : i32
    return %arg0, %c0_i32 : i32, i32
  }
  func.func @transform_2(%arg0: i32) -> (i32, i32) {
    %c0_i32 = arith.constant 0 : i32
    %c0_i32_0 = arith.constant 0 : i32
    %c0_i32_1 = arith.constant 0 : i32
    return %c0_i32, %c0_i32_0 : i32, i32
  }
  func.func @transform_3(%arg0: i32) -> (i32, i32) {
    %c0_i32 = arith.constant 0 : i32
    %c0_i32_0 = arith.constant 0 : i32
    %c0_i32_1 = arith.constant 0 : i32
    return %c0_i32, %c0_i32_0 : i32, i32
  }
  func.func @transform_4(%arg0: i32) -> (i32, i32) {
    %c0_i32 = arith.constant 0 : i32
    %c0_i32_0 = arith.constant 0 : i32
    %c0_i32_1 = arith.constant 0 : i32
    return %c0_i32, %c0_i32_0 : i32, i32
  }
  func.func @transform_5(%arg0: i32) -> (i32, i32) {
    %c0_i32 = arith.constant 0 : i32
    %c0_i32_0 = arith.constant 0 : i32
    %c0_i32_1 = arith.constant 0 : i32
    return %c0_i32, %c0_i32_0 : i32, i32
  }
  func.func @transform_6(%arg0: i32) -> (i32, i32) {
    %c0_i32 = arith.constant 0 : i32
    %c0_i32_0 = arith.constant 0 : i32
    return %arg0, %c0_i32 : i32, i32
  }
}

</mosaic_0001>

<bundles_post_ra>
// kernel: tpu_custom_call.1
= control target key start
LH: loop header
LB: loop body
LE: loop exit
PB: predicated region body
PF: predicated region fallthrough
CT: control target
= control target key end

     0   :  { %s1570_s0 = inlined_call_operand.hbm [shape: f32[32,128], index: 0, kind: input, shape index: {}]   ;;  %s1571_s1 = inlined_call_operand.hbm [shape: f32[32,128], index: 1, kind: input, shape index: {}]   ;;  %s1572_s2 = inlined_call_operand.hbm [shape: f32[128,256], index: 2, kind: input, shape index: {}]   ;;  %s1573_s3 = inlined_call_operand.hbm [shape: f32[128,256], index: 3, kind: input, shape index: {}]   ;;  %s1574_s4 = inlined_call_operand.vmem [shape: f32[1,128], index: 4, kind: input, shape index: {}]   ;;  %s1575_s5 = inlined_call_operand.hbm [shape: f32[128,128], index: 5, kind: input, shape index: {}]   ;;  %s1576_s6 = inlined_call_operand.hbm [shape: f32[32,128], index: 6, kind: output, shape index: {}]  }
   0x1   :  { %1584 = sst [smem:[#allocation18_spill]] %s1570_s0 }
   0x2   :  { %1585 = sst [smem:[#allocation19_spill]] %s1572_s2 }
   0x3   :  { %1586 = sst [smem:[#allocation20_spill]] %s1573_s3 }
   0x4   :  { %1587 = sst [smem:[#allocation21_spill]] %s1575_s5 }
   0x5   :  { %11 = vsyncpa [#allocation3], 0 }
   0x6   :  { %13 = vsyncpa [#allocation3 + $0x1], 0 }
   0x7   :  { %14 = vsyncpa [#allocation6], 0 }
   0x8   :  { %16 = vsyncpa [#allocation6 + $0x1], 0 }
   0x9   :  { %17 = vsyncpa [#allocation9], 0 }
   0xa   :  { %18 = vsyncpa [#allocation4], 0 }
   0xb   :  { %20 = vsyncpa [#allocation4 + $0x1], 0  ;;  %s1280_s21 = smov 0   ;;  %s1282_s22 = smov 0  }
   0xc   :  { %s1284_s23 = smov 0   ;;  %s1286_s24 = smov 0  }
   0xd LB: > { %s1301_s25 = sadd.s32 4294967295, %s1230_s24   ;;  %s846_s26 = sadd.s32 4294967294, %s1230_s24   ;;  %s1230_s24 = sphi %s1286_s24, %s1614_s24   ;;  %s1226_s23 = sphi %s1284_s23, %s1613_s23   ;;  %s1222_s22 = sphi %s1282_s22, %s1612_s22   ;;  %s1218_s21 = sphi %s1280_s21, %s1611_s21  }
   0xe   : > { %p46_p0 = scmp.ne.s32.totalorder %s1222_s22, %s1218_s21  ;;  %p1577_p1 = scmp.eq.s32.totalorder %s1301_s25, 0 }
   0xf   : > { %p186_p3 = scmp.eq.s32.totalorder %s846_s26, 1  ;;  %p847_p5 = scmp.ge.s32.totalorder %s1230_s24, 1 }
  0x10   : > { %p1310_p4 = por %p1577_p1, %p46_p0  ;;  %p193_p7 = scmp.lt.s32.totalorder %s1230_s24, 3 }
  0x11   : > { %p1315_p6 = por %p186_p3, %p46_p0  ;;  %s1232_s30 = smov [#allocation7]  }
  0x12   : > { %s1588_s27 = scalar_select %p1310_p4, 1, 0 }
  0x13   : > { %s1589_s28 = scalar_select %p1315_p6, 1, 0 }
  0x14   : > { %p1320_p8 = pnand %p847_p5, %p193_p7  ;;  %s205_s7 = sshll.u32 %s1232_s30, 4  ;;  %s206_s7 = int_to_ptr.vmem [resolvable:$true] %s205_s7 }
  0x15   : > { %s1233_s9 = smov [#allocation8]   ;;  %s1234_s11 = smov [#allocation10]  }
  0x16   : > { %p945_p9 = pneg %p1320_p8  ;;  %s218_s10 = sshll.u32 %s1233_s9, 4  ;;  %s219_s10 = int_to_ptr.vmem [resolvable:$true] %s218_s10 }
  0x17   : > { %s234_s12 = sshll.u32 %s1234_s11, 4  ;;  %s1031_s13 = scalar_lea.vmem %s206_s7, 4096  ;;  %s235_s12 = int_to_ptr.vmem [resolvable:$true] %s234_s12 }
  0x18   : > { %p1329_p11 = pnand %p945_p9, %p1577_p1  ;;  %p1032_p13 = scmp.ne.s32.totalorder %s206_s7, %s1031_s13 }
  0x19   : > { %p1039_p5 = scmp.lt.s32.totalorder %s206_s7, %s206_s7  ;;  %p1040_p7 = scmp.lt.s32.totalorder %s1031_s13, %s1031_s13 }
  0x1a   : > { %p1022_p12 = pneg %p1329_p11 }
  0x1b   : > { %p1041_p9 = por %p1040_p7, %p1039_p5 }
  0x1c   : > { %p1034_p0 = pnand %p1032_p13, %p1022_p12 }
  0x1e   : > { %p1035_p3 = pneg %p1034_p0 }
  0x20   : > { %p1042_p10 = pnand %p1041_p9, %p1035_p3 }
  0x22   : > { %1045 = shalt.err (!%p1042_p10)
}
  0x23   : > { %s1235_s14 = smov 256   ;;  %s1236_s15 = smov 16  }
  0x24   : > { %s1592_s2 = sld [smem:[#allocation19_spill]]  ;;  %s1057_s18 = scalar_lea.vmem %s219_s10, 4096 }
  0x25   : > { %p1058_p1 = scmp.ne.s32.totalorder %s219_s10, %s1057_s18  ;;  %p1065_p2 = scmp.lt.s32.totalorder %s219_s10, %s219_s10 }
  0x26   : > { %p1066_p6 = scmp.lt.s32.totalorder %s1057_s18, %s1057_s18 }
  0x27   : > { %p1060_p13 = pnand %p1058_p1, %p1022_p12 }
  0x28   : > { %p1067_p5 = por %p1066_p6, %p1065_p2 }
  0x29   : > { %p1061_p0 = pneg %p1060_p13 }
  0x2a   : > { %948 = dma.hbm_to_vmem [thread:$0]  (!%p1329_p11), %s1592_s2, 4096, %s206_s7, [#allocation6], %s1235_s14, %s1235_s14, %s1236_s15  }
  0x2b   : > { %p1068_p3 = pnand %p1067_p5, %p1061_p0 }
  0x2d   : > { %1071 = shalt.err (!%p1068_p3)
}
  0x2e   : > { %s1593_s3 = sld [smem:[#allocation20_spill]]  ;;  %s1083_s26 = scalar_lea.vmem %s235_s12, 2048 }
  0x2f   : > { %p1084_p10 = scmp.ne.s32.totalorder %s235_s12, %s1083_s26  ;;  %p1091_p9 = scmp.lt.s32.totalorder %s235_s12, %s235_s12 }
  0x30   : > { %p1092_p13 = scmp.lt.s32.totalorder %s1083_s26, %s1083_s26 }
  0x31   : > { %p1086_p7 = pnand %p1084_p10, %p1022_p12 }
  0x32   : > { %p1093_p4 = por %p1092_p13, %p1091_p9 }
  0x33   : > { %p1087_p1 = pneg %p1086_p7 }
  0x34   : > { %951 = dma.hbm_to_vmem [thread:$0]  (!%p1329_p11), %s1593_s3, 4096, %s219_s10, [#allocation9], %s1235_s14, %s1235_s14, %s1236_s15  }
  0x35   : > { %p1094_p2 = pnand %p1093_p4, %p1087_p1 }
  0x37   : > { %1097 = shalt.err (!%p1094_p2)
}
  0x38   : > { %s1579_s30 = smov 128   ;;  %s1581_s7 = smov 8  }
  0x39   : > { %s1594_s5 = sld [smem:[#allocation21_spill]]  ;;  %s1363_s11 = sadd.s32 1, %s1230_s24  }
  0x3a   : > { %s30_s13 = ssub.s32 %s1230_s24, %s1363_s11  ;;  %s33_s14 = sadd.s32 1, %s1226_s23 }
  0x3b   : > { %p31_p4 = scmp.eq.s32.totalorder %s30_s13, 0  ;;  %p40_p6 = scmp.ne.s32.totalorder %s1226_s23, %s1222_s22 }
  0x3c   : > { %p41_p12 = scmp.eq.s32.totalorder %s1230_s24, 0  ;;  %p969_p0 = scmp.lt.s32.totalorder %s1230_s24, 2 }
  0x3d   : > { %s1373_s15 = scalar_select %p31_p4, %s1226_s23, %s33_s14  }
  0x3e   : > { %p42_p5 = por %p41_p12, %p40_p6  ;;  %p1596_p3 = scmp.eq.s32.totalorder %s1301_s25, 1 }
  0x3f   : > { %954 = dma.hbm_to_vmem [thread:$0]  (!%p1329_p11), %s1594_s5, 2048, %s235_s12, [#allocation9], %s1579_s30, %s1579_s30, %s1581_s7  }
  0x40   : > { %1595 = sst [smem:[#allocation17_spill]] %s1373_s15  ;;  %p1377_p10 = por %p1596_p3, %p40_p6 }
  0x41   : > { %s248_s16 = sand.u32 1, %s1226_s23   ;;  %s871_s17 = sshll.u32 %s1230_s24, 8 }
  0x42   : > { %s1597_s8 = scalar_select %p1377_p10, 1, 0 }
  0x43   : > { %s1383_s12 = sshll.u32 %s248_s16, 4  ;;  %s1598_s0 = sld [smem:[#allocation18_spill]] }
  0x44   : > { %s252_s26 = scalar_lea.vmem [#allocation2], %s1383_s12  ;;  %p1391_p11 = pnand %p969_p0, %p42_p5 }
  0x45   : > { %s259_s9 = sshll.u32 %s252_s26, 4  ;;  %s1400_s18 = scalar_lea.hbm %s1571_s1, %s871_s17  ;;  %s1395_s9 = int_to_ptr.vmem [resolvable:$true] %s259_s9 }
  0x46   : > { %s1402_s19 = scalar_lea.sflag [#allocation3], %s248_s16  ;;  %p1100_p1 = pneg %p1391_p11 }
  0x49   : > { %s1388_s20 = scalar_lea.hbm %s1598_s0, %s871_s17  ;;  %s1103_s2 = scalar_lea.hbm %s1598_s0, 512 }
  0x4a   : > { %s1098_s30 = scalar_lea.hbm %s1388_s20, 256  ;;  %p1104_p2 = scmp.lt.s32.totalorder %s1388_s20, %s1598_s0 }
  0x4b   : > { %p1099_p7 = scmp.ne.s32.totalorder %s1388_s20, %s1098_s30  ;;  %p1105_p4 = scmp.lt.s32.totalorder %s1103_s2, %s1098_s30 }
  0x4d   : > { %p1101_p9 = pnand %p1100_p1, %p1099_p7  ;;  %p1106_p6 = por %p1105_p4, %p1104_p2 }
  0x4f   : > { %p1102_p13 = pneg %p1101_p9 }
  0x51   : > { %p1107_p12 = pnand %p1106_p6, %p1102_p13 }
  0x53   : > { %1110 = shalt.err (!%p1107_p12)
}
  0x54   : > { %s1111_s16 = scalar_lea.vmem %s1395_s9, 256  ;;  %s1239_s7 = smov [#allocation2]  }
  0x55   : > { %p1112_p0 = scmp.ne.s32.totalorder %s1395_s9, %s1111_s16  ;;  %s1116_s17 = sshll.u32 %s1239_s7, 4  ;;  %s1117_s17 = int_to_ptr.vmem [resolvable:$false] %s1116_s17 }
  0x56   : > { %s1118_s13 = scalar_lea.vmem %s1117_s17, 512  ;;  %p1119_p7 = scmp.lt.s32.totalorder %s1395_s9, %s1117_s17 }
  0x57   : > { %p1114_p5 = pnand %p1112_p0, %p1100_p1  ;;  %p1120_p9 = scmp.lt.s32.totalorder %s1118_s13, %s1111_s16 }
  0x59   : > { %p1115_p3 = pneg %p1114_p5  ;;  %p1121_p10 = por %p1120_p9, %p1119_p7 }
  0x5b   : > { %p1122_p2 = pnand %p1121_p10, %p1115_p3 }
  0x5d   : > { %1125 = shalt.err (!%p1122_p2)
}
  0x5e   : > { %s1600_s2 = smov 8   ;;  %s1601_s3 = smov 128  }
  0x5f   : > { %958 = dma.hbm_to_vmem [thread:$0]  (!%p1391_p11), %s1388_s20, 256, %s1395_s9, %s1402_s19, %s1601_s3, %s1601_s3, %s1600_s2  }
  0x60   : > { %s273_s5 = scalar_lea.vmem [#allocation5], %s1383_s12  ;;  %s269_s14 = sand.u32 1, %s1230_s24  }
  0x61   : > { %s280_s30 = sshll.u32 %s273_s5, 4  ;;  %s270_s26 = scalar_lea.sflag [#allocation6], %s269_s14  ;;  %s1434_s30 = int_to_ptr.vmem [resolvable:$true] %s280_s30 }
  0x62   : > { %s1126_s16 = scalar_lea.hbm %s1400_s18, 256  ;;  %s1131_s13 = scalar_lea.hbm %s1571_s1, 512 }
  0x63   : > { %p1127_p10 = scmp.ne.s32.totalorder %s1400_s18, %s1126_s16  ;;  %p1132_p6 = scmp.lt.s32.totalorder %s1400_s18, %s1571_s1 }
  0x64   : > { %p1133_p12 = scmp.lt.s32.totalorder %s1131_s13, %s1126_s16 }
  0x65   : > { %p1129_p13 = pnand %p1127_p10, %p1100_p1 }
  0x66   : > { %p1134_p0 = por %p1133_p12, %p1132_p6 }
  0x67   : > { %p1130_p4 = pneg %p1129_p13 }
  0x69   : > { %p1135_p5 = pnand %p1134_p0, %p1130_p4 }
  0x6b   : > { %1138 = shalt.err (!%p1135_p5)
}
  0x6c   : > { %s1139_s12 = scalar_lea.vmem %s1434_s30, 256  ;;  %s1240_s20 = smov [#allocation5]  }
  0x6d   : > { %p1140_p3 = scmp.ne.s32.totalorder %s1434_s30, %s1139_s12  ;;  %s1144_s9 = sshll.u32 %s1240_s20, 4  ;;  %s1145_s9 = int_to_ptr.vmem [resolvable:$false] %s1144_s9 }
  0x6e   : > { %s1146_s19 = scalar_lea.vmem %s1145_s9, 512  ;;  %p1147_p2 = scmp.lt.s32.totalorder %s1434_s30, %s1145_s9 }
  0x6f   : > { %p1142_p7 = pnand %p1140_p3, %p1100_p1  ;;  %p1148_p10 = scmp.lt.s32.totalorder %s1146_s19, %s1139_s12 }
  0x71   : > { %p1143_p9 = pneg %p1142_p7  ;;  %p1149_p13 = por %p1148_p10, %p1147_p2 }
  0x73   : > { %p1150_p6 = pnand %p1149_p13, %p1143_p9 }
  0x75   : > { %1153 = shalt.err (!%p1150_p6)
}
  0x76   : > { %961 = dma.hbm_to_vmem [thread:$0]  (!%p1391_p11), %s1400_s18, 256, %s1434_s30, %s270_s26, %s1601_s3, %s1601_s3, %s1600_s2  }
  0x77   : > { %292 = sbr.rel (%p1320_p8) target bundleno = 609 (0x261), region = 44  ;;  %s1464_s0 = sand.u32 (!%p1320_p8), 1, %s1222_s22  }
  0x78   : > { %s1467_s15 = sshll.u32 (!%p1320_p8), %s1464_s0, 4  ;;  %s295_s5 = scalar_lea.sflag (!%p1320_p8), [#allocation3], %s1464_s0 }
  0x79   : > { %s298_s10 = scalar_lea.vmem (!%p1320_p8), [#allocation2], %s1467_s15  ;;  %p1602_p1 = scmp.ne.s32.totalorder (!%p1320_p8), %s1588_s27, 0 }
  0x7c   : > { %1197 = dma.done.wait (%p1602_p1), %s295_s5, 256  }
  0x7d   : > { %1199 = vsyncadd (%p1602_p1), %s295_s5, 4294967040  ;;  %s303_s29 = sand.u32 1, %s1301_s25   ;;  %s307_s2 = scalar_lea.vmem [#allocation5], %s1467_s15 }
  0x7e   : > { %s304_s18 = scalar_lea.sflag [#allocation6], %s303_s29 }
  0x7f   : > { %1201 = dma.done.wait (%p1602_p1), %s304_s18, 256  }
  0x80   : > { %1203 = vsyncadd (%p1602_p1), %s304_s18, 4294967040  ;;  %p1603_p8 = scmp.eq.s32.totalorder %s1301_s25, 0 }
  0x82   : > { %1205 = dma.done.wait (%p1603_p8), [#allocation6], 4096   ;;  %p1604_p11 = pmov %p1603_p8 }
  0x83   : > { %p1605_p4 = pmov %p1603_p8 }
  0x84   : > { %1207 = vsyncadd (%p1604_p11), [#allocation6], 4294963200 }
  0x85   : > { %1209 = dma.done.wait (%p1605_p4), [#allocation9], 6144   ;;  %p1606_p12 = pmov %p1605_p4 }
  0x86   : > { %v1241_v0 = vmov 0.0   ;;  %v423_v1 = vld [vmem:[#allocation8 + $0xf8] sm:$0xff]  ;;  %v422_v3 = vld [vmem:[#allocation8 + $0xf0] sm:$0xff]  ;;  %v421_v5 = vld [vmem:[#allocation8 + $0xe8] sm:$0xff]  ;;  %s873_s30 = sshll.u32 %s1301_s25, 8  ;;  %s352_s14 = scalar_lea.vmem [#allocation11], %s1467_s15 }
  0x87   : > { %1211 = vsyncadd (%p1606_p12), [#allocation9], 4294961152  ;;  %488 = vmatprep.mubr.f32.mxu0 %v1241_v0  ;;  %565 = vmatprep.mubr.f32.mxu1 %v1241_v0  ;;  %v391_v2 = vld [vmem:[#allocation7 + $0xf8] sm:$0xff]  ;;  %v390_v4 = vld [vmem:[#allocation7 + $0xf0] sm:$0xff]  ;;  %s722_s26 = sshll.u32 %s352_s14, 4  ;;  %s1525_s17 = scalar_lea.hbm %s1576_s6, %s873_s30  ;;  %s1527_s26 = int_to_ptr.vmem [resolvable:$true] %s722_s26 }
  0x88   : > { %424 = vmatprep.subr.mxu0 %v423_v1  ;;  %501 = vmatprep.subr.mxu1 %v391_v2  ;;  %v389_v6 = vld [vmem:[#allocation7 + $0xe8] sm:$0xff]  ;;  %v420_v7 = vld [vmem:[#allocation8 + $0xe0] sm:$0xff]  ;;  %v419_v9 = vld [vmem:[#allocation8 + $0xd8] sm:$0xff]  ;;  %s709_s13 = scalar_lea.sflag [#allocation4], %s1464_s0  ;;  %s1154_s25 = scalar_lea.vmem %s1527_s26, 256 }
  0x89   : > { %425 = vmatpush1.msra.mxu0 %v422_v3  ;;  %502 = vmatpush1.msra.mxu1 %v390_v4  ;;  %v388_v8 = vld [vmem:[#allocation7 + $0xe0] sm:$0xff]  ;;  %v387_v10 = vld [vmem:[#allocation7 + $0xd8] sm:$0xff]  ;;  %v418_v11 = vld [vmem:[#allocation8 + $0xd0] sm:$0xff]  ;;  %p1155_p0 = scmp.ne.s32.totalorder %s1527_s26, %s1154_s25  ;;  %p1607_p5 = scmp.ne.s32.totalorder %s1597_s8, 0 }
  0x8a   : > { %426 = vmatprep.subr.mxu0 %v421_v5  ;;  %503 = vmatprep.subr.mxu1 %v389_v6  ;;  %v386_v12 = vld [vmem:[#allocation7 + $0xd0] sm:$0xff]  ;;  %v417_v13 = vld [vmem:[#allocation8 + $0xc8] sm:$0xff]  ;;  %v416_v15 = vld [vmem:[#allocation8 + $0xc0] sm:$0xff]  ;;  %s1242_s12 = smov [#allocation11]  }
  0x8b   : > { %427 = vmatpush1.msra.mxu0 %v420_v7  ;;  %504 = vmatpush1.msra.mxu1 %v388_v8  ;;  %v385_v14 = vld [vmem:[#allocation7 + $0xc8] sm:$0xff]  ;;  %v384_v16 = vld [vmem:[#allocation7 + $0xc0] sm:$0xff]  ;;  %v415_v17 = vld [vmem:[#allocation8 + $0xb8] sm:$0xff]  ;;  %p1156_p3 = pnand %p1155_p0, %p1607_p5  ;;  %s1158_s20 = sshll.u32 %s1242_s12, 4  ;;  %s1159_s20 = int_to_ptr.vmem [resolvable:$false] %s1158_s20 }
  0x8c   : > { %428 = vmatprep.subr.mxu0 %v419_v9  ;;  %505 = vmatprep.subr.mxu1 %v387_v10  ;;  %v383_v18 = vld [vmem:[#allocation7 + $0xb8] sm:$0xff]  ;;  %v414_v19 = vld [vmem:[#allocation8 + $0xb0] sm:$0xff]  ;;  %v413_v21 = vld [vmem:[#allocation8 + $0xa8] sm:$0xff]  ;;  %s1160_s9 = scalar_lea.vmem %s1159_s20, 512  ;;  %p1161_p9 = scmp.lt.s32.totalorder %s1527_s26, %s1159_s20 }
  0x8d   : > { %429 = vmatpush1.msra.mxu0 %v418_v11  ;;  %506 = vmatpush1.msra.mxu1 %v386_v12  ;;  %v382_v20 = vld [vmem:[#allocation7 + $0xb0] sm:$0xff]  ;;  %v381_v22 = vld [vmem:[#allocation7 + $0xa8] sm:$0xff]  ;;  %v412_v23 = vld [vmem:[#allocation8 + $0xa0] sm:$0xff]  ;;  %p1157_p7 = pneg %p1156_p3  ;;  %p1162_p2 = scmp.lt.s32.totalorder %s1160_s9, %s1154_s25 }
  0x8e   : > { %430 = vmatprep.subr.mxu0 %v417_v13  ;;  %507 = vmatprep.subr.mxu1 %v385_v14  ;;  %v380_v24 = vld [vmem:[#allocation7 + $0xa0] sm:$0xff]  ;;  %v411_v25 = vld [vmem:[#allocation8 + $0x98] sm:$0xff]  ;;  %v410_v27 = vld [vmem:[#allocation8 + $0x90] sm:$0xff] }
  0x8f   : > { %431 = vmatpush1.msra.mxu0 %v416_v15  ;;  %508 = vmatpush1.msra.mxu1 %v384_v16  ;;  %v379_v26 = vld [vmem:[#allocation7 + $0x98] sm:$0xff]  ;;  %v378_v28 = vld [vmem:[#allocation7 + $0x90] sm:$0xff]  ;;  %v409_v29 = vld [vmem:[#allocation8 + $0x88] sm:$0xff]  ;;  %p1163_p10 = por %p1162_p2, %p1161_p9 }
  0x90   : > { %432 = vmatprep.subr.mxu0 %v415_v17  ;;  %509 = vmatprep.subr.mxu1 %v383_v18  ;;  %v377_v30 = vld [vmem:[#allocation7 + $0x88] sm:$0xff]  ;;  %v408_v31 = vld [vmem:[#allocation8 + $0x80] sm:$0xff]  ;;  %v407_v33 = vld [vmem:[#allocation8 + $0x78] sm:$0xff] }
  0x91   : > { %433 = vmatpush1.msra.mxu0 %v414_v19  ;;  %510 = vmatpush1.msra.mxu1 %v382_v20  ;;  %v376_v32 = vld [vmem:[#allocation7 + $0x80] sm:$0xff]  ;;  %v375_v34 = vld [vmem:[#allocation7 + $0x78] sm:$0xff]  ;;  %v406_v35 = vld [vmem:[#allocation8 + $0x70] sm:$0xff]  ;;  %p1164_p13 = pnand %p1163_p10, %p1157_p7 }
  0x92   : > { %434 = vmatprep.subr.mxu0 %v413_v21  ;;  %511 = vmatprep.subr.mxu1 %v381_v22  ;;  %v374_v36 = vld [vmem:[#allocation7 + $0x70] sm:$0xff]  ;;  %v405_v37 = vld [vmem:[#allocation8 + $0x68] sm:$0xff]  ;;  %v404_v39 = vld [vmem:[#allocation8 + $0x60] sm:$0xff] }
  0x93   : > { %435 = vmatpush1.msra.mxu0 %v412_v23  ;;  %512 = vmatpush1.msra.mxu1 %v380_v24  ;;  %v373_v38 = vld [vmem:[#allocation7 + $0x68] sm:$0xff]  ;;  %v372_v40 = vld [vmem:[#allocation7 + $0x60] sm:$0xff]  ;;  %v403_v41 = vld [vmem:[#allocation8 + $0x58] sm:$0xff] }
  0x94   : > { %436 = vmatprep.subr.mxu0 %v411_v25  ;;  %513 = vmatprep.subr.mxu1 %v379_v26  ;;  %v371_v42 = vld [vmem:[#allocation7 + $0x58] sm:$0xff]  ;;  %v402_v43 = vld [vmem:[#allocation8 + $0x50] sm:$0xff]  ;;  %v401_v45 = vld [vmem:[#allocation8 + $0x48] sm:$0xff] }
  0x95   : > { %437 = vmatpush1.msra.mxu0 %v410_v27  ;;  %514 = vmatpush1.msra.mxu1 %v378_v28  ;;  %v370_v44 = vld [vmem:[#allocation7 + $0x50] sm:$0xff]  ;;  %v369_v46 = vld [vmem:[#allocation7 + $0x48] sm:$0xff]  ;;  %v400_v47 = vld [vmem:[#allocation8 + $0x40] sm:$0xff] }
  0x96   : > { %438 = vmatprep.subr.mxu0 %v409_v29  ;;  %515 = vmatprep.subr.mxu1 %v377_v30  ;;  %v368_v48 = vld [vmem:[#allocation7 + $0x40] sm:$0xff]  ;;  %v399_v49 = vld [vmem:[#allocation8 + $0x38] sm:$0xff]  ;;  %v398_v51 = vld [vmem:[#allocation8 + $0x30] sm:$0xff] }
  0x97   : > { %439 = vmatpush1.msra.mxu0 %v408_v31  ;;  %516 = vmatpush1.msra.mxu1 %v376_v32  ;;  %v367_v50 = vld [vmem:[#allocation7 + $0x38] sm:$0xff]  ;;  %v366_v52 = vld [vmem:[#allocation7 + $0x30] sm:$0xff]  ;;  %v397_v53 = vld [vmem:[#allocation8 + $0x28] sm:$0xff] }
  0x98   : > { %440 = vmatprep.subr.mxu0 %v407_v33  ;;  %517 = vmatprep.subr.mxu1 %v375_v34  ;;  %v365_v54 = vld [vmem:[#allocation7 + $0x28] sm:$0xff]  ;;  %v396_v55 = vld [vmem:[#allocation8 + $0x20] sm:$0xff]  ;;  %v395_v57 = vld [vmem:[#allocation8 + $0x18] sm:$0xff] }
  0x99   : > { %441 = vmatpush1.msra.mxu0 %v406_v35  ;;  %518 = vmatpush1.msra.mxu1 %v374_v36  ;;  %v364_v56 = vld [vmem:[#allocation7 + $0x20] sm:$0xff]  ;;  %v363_v58 = vld [vmem:[#allocation7 + $0x18] sm:$0xff]  ;;  %v394_v59 = vld [vmem:[#allocation8 + $0x10] sm:$0xff] }
  0x9a   : > { %442 = vmatprep.subr.mxu0 %v405_v37  ;;  %519 = vmatprep.subr.mxu1 %v373_v38  ;;  %v362_v60 = vld [vmem:[#allocation7 + $0x10] sm:$0xff]  ;;  %v393_v61 = vld [vmem:[#allocation8 + $0x8] sm:$0xff]  ;;  %v392_v63 = vld [vmem:[#allocation8] sm:$0xff] }
  0x9b   : > { %443 = vmatpush1.msra.mxu0 %v404_v39  ;;  %520 = vmatpush1.msra.mxu1 %v372_v40  ;;  %v361_v62 = vld [vmem:[#allocation7 + $0x8] sm:$0xff]  ;;  %v360_v1 = vld [vmem:[#allocation7] sm:$0xff]  ;;  %v624_v4 = vld [vmem:[#allocation10 + $0x78] sm:$0xff] }
  0x9c   : > { %444 = vmatprep.subr.mxu0 %v403_v41  ;;  %521 = vmatprep.subr.mxu1 %v371_v42  ;;  %v1493_v2 = vld [vmem:[%s307_s2] sm:$0xff]  ;;  %v1505_v5 = vld [vmem:[%s307_s2 + $0x8] sm:$0xff] }
  0x9d   : > { %445 = vmatpush1.msra.mxu0 %v402_v43  ;;  %522 = vmatpush1.msra.mxu1 %v370_v44  ;;  %v1497_v3 = vld [vmem:[%s298_s10] sm:$0xff]  ;;  %v1509_v6 = vld [vmem:[%s298_s10 + $0x8] sm:$0xff] }
  0x9e   : > { %446 = vmatprep.subr.mxu0 %v401_v45  ;;  %523 = vmatprep.subr.mxu1 %v369_v46  ;;  %v623_v7 = vld [vmem:[#allocation10 + $0x70] sm:$0xff]  ;;  %v622_v8 = vld [vmem:[#allocation10 + $0x68] sm:$0xff]  ;;  %v621_v9 = vld [vmem:[#allocation10 + $0x60] sm:$0xff] }
  0x9f   : > { %447 = vmatpush1.msra.mxu0 %v400_v47  ;;  %524 = vmatpush1.msra.mxu1 %v368_v48  ;;  %v619_v10 = vld [vmem:[#allocation10 + $0x50] sm:$0xff]  ;;  %v618_v11 = vld [vmem:[#allocation10 + $0x48] sm:$0xff]  ;;  %v617_v12 = vld [vmem:[#allocation10 + $0x40] sm:$0xff] }
  0xa0   : > { %448 = vmatprep.subr.mxu0 %v399_v49  ;;  %525 = vmatprep.subr.mxu1 %v367_v50  ;;  %v616_v13 = vld [vmem:[#allocation10 + $0x38] sm:$0xff]  ;;  %v615_v14 = vld [vmem:[#allocation10 + $0x30] sm:$0xff]  ;;  %v614_v15 = vld [vmem:[#allocation10 + $0x28] sm:$0xff] }
  0xa1   : > { %449 = vmatpush1.msra.mxu0 %v398_v51  ;;  %526 = vmatpush1.msra.mxu1 %v366_v52  ;;  %v613_v16 = vld [vmem:[#allocation10 + $0x20] sm:$0xff]  ;;  %v612_v17 = vld [vmem:[#allocation10 + $0x18] sm:$0xff]  ;;  %v611_v18 = vld [vmem:[#allocation10 + $0x10] sm:$0xff] }
  0xa2   : > { %450 = vmatprep.subr.mxu0 %v397_v53  ;;  %527 = vmatprep.subr.mxu1 %v365_v54  ;;  %v610_v19 = vld [vmem:[#allocation10 + $0x8] sm:$0xff]  ;;  %v609_v20 = vld [vmem:[#allocation10] sm:$0xff] }
  0xa3   : > { %451 = vmatpush1.msra.mxu0 %v396_v55  ;;  %528 = vmatpush1.msra.mxu1 %v364_v56  ;;  %v865_v31 = vld [vmem:[%s1574_s4] ss:$0 sm:$0xff] }
  0xa4   : > { %452 = vmatprep.subr.mxu0 %v395_v57  ;;  %529 = vmatprep.subr.mxu1 %v363_v58 }
  0xa5   : > { %453 = vmatpush1.msra.mxu0 %v394_v59  ;;  %530 = vmatpush1.msra.mxu1 %v362_v60 }
  0xa6   : > { %454 = vmatprep.subr.mxu0 %v393_v61  ;;  %531 = vmatprep.subr.mxu1 %v361_v62 }
  0xa7   : > { %455 = vmatpush1.msra.mxu0 %v392_v63  ;;  %532 = vmatpush1.msra.mxu1 %v360_v1 }
  0xa8   : > { %489 = vmatmul.mubr.f32.vlgmr.msra.gmra.mxu0 %v1493_v2  ;;  %566 = vmatmul.mubr.f32.vlgmr.msra.gmra.mxu1 %v1497_v3 }
  0xa9   : > { %494 = vmatprep.mubr.f32.mxu0 %v1241_v0  ;;  %571 = vmatprep.mubr.f32.mxu1 %v1241_v0  ;;  %v620_v0 = vld [vmem:[#allocation10 + $0x58] sm:$0xff] }
  0xaa   : > { %892 = vmatprep.subr.mxu0 %v624_v4 }
  0xab   : > { %893 = vmatpush3.msra.mxu0 %v624_v4 }
  0xac   : > { %495 = vmatmul.mubr.f32.gmra.mxu0 %v1505_v5  ;;  %572 = vmatmul.mubr.f32.gmra.mxu1 %v1509_v6 }
  0xad   : > { %894 = vmatprep.subr.mxu0 %v623_v7 }
  0xae   : > { %895 = vmatpush3.msra.mxu0 %v623_v7 }
  0xaf   : > { %896 = vmatprep.subr.mxu0 %v622_v8 }
  0xb0   : > { %897 = vmatpush3.msra.mxu0 %v622_v8 }
  0xb1   : > { %898 = vmatprep.subr.mxu0 %v621_v9 }
  0xb2   : > { %899 = vmatpush3.msra.mxu0 %v621_v9 }
  0xb3   : > { %900 = vmatprep.subr.mxu0 %v620_v0 }
  0xb4   : > { %901 = vmatpush3.msra.mxu0 %v620_v0 }
  0xb5   : > { %902 = vmatprep.subr.mxu0 %v619_v10 }
  0xb6   : > { %903 = vmatpush3.msra.mxu0 %v619_v10 }
  0xb7   : > { %904 = vmatprep.subr.mxu0 %v618_v11 }
  0xb8   : > { %905 = vmatpush3.msra.mxu0 %v618_v11 }
  0xb9   : > { %906 = vmatprep.subr.mxu0 %v617_v12 }
  0xba   : > { %907 = vmatpush3.msra.mxu0 %v617_v12 }
  0xbb   : > { %908 = vmatprep.subr.mxu0 %v616_v13 }
  0xbc   : > { %909 = vmatpush3.msra.mxu0 %v616_v13 }
  0xbd   : > { %910 = vmatprep.subr.mxu0 %v615_v14 }
  0xbe   : > { %911 = vmatpush3.msra.mxu0 %v615_v14 }
  0xbf   : > { %912 = vmatprep.subr.mxu0 %v614_v15 }
  0xc0   : > { %913 = vmatpush3.msra.mxu0 %v614_v15 }
  0xc1   : > { %914 = vmatprep.subr.mxu0 %v613_v16 }
  0xc2   : > { %915 = vmatpush3.msra.mxu0 %v613_v16 }
  0xc3   : > { %916 = vmatprep.subr.mxu0 %v612_v17 }
  0xc4   : > { %917 = vmatpush3.msra.mxu0 %v612_v17 }
  0xc5   : > { %918 = vmatprep.subr.mxu0 %v611_v18 }
  0xc6   : > { %919 = vmatpush3.msra.mxu0 %v611_v18 }
  0xc7   : > { %920 = vmatprep.subr.mxu0 %v610_v19 }
  0xc8   : > { %921 = vmatpush3.msra.mxu0 %v610_v19 }
  0xc9   : > { %922 = vmatprep.subr.mxu0 %v609_v20 }
  0xca   : > { %923 = vmatpush3.msra.mxu0 %v609_v20 }
 0x168   : > { %v490_v21 = vpop.f32.mrf.mxu0  ;;  %v567_v22 = vpop.f32.mrf.mxu1 }
 0x169   : > { %v568_v23 = vadd.f32 %v567_v22, %v490_v21 }
 0x16a   : > { %v492_v24 = vpop.f32.mrf.mxu0  ;;  %v569_v25 = vpop.f32.mrf.mxu1 }
 0x16b   : > { %vm578_vm0 = vcmp.gt.f32.partialorder %v568_v23, 0.0  ;;  %v582_v26 = vmul.f32 0.2, %v568_v23  ;;  %v570_v27 = vadd.f32 %v569_v25, %v492_v24 }
 0x16c   : > { %v496_v28 = vpop.f32.mrf.mxu0  ;;  %v573_v29 = vpop.f32.mrf.mxu1 }
 0x16d   : > { %v586_v30 = vsel %vm578_vm0, %v568_v23, %v582_v26  ;;  %v574_v32 = vadd.f32 %v573_v29, %v496_v28  ;;  %v583_v36 = vmul.f32 0.2, %v570_v27  ;;  %vm579_vm2 = vcmp.gt.f32.partialorder %v570_v27, 0.0 }
 0x16e   : > { %v590_v33 = vadd.f32 1.0, %v586_v30  ;;  %v498_v34 = vpop.f32.mrf.mxu0  ;;  %v575_v35 = vpop.f32.mrf.mxu1 }
 0x16f   : > { %vm580_vm1 = vcmp.gt.f32.partialorder %v574_v32, 0.0  ;;  %v584_v37 = vmul.f32 0.2, %v574_v32  ;;  %v576_v38 = vadd.f32 %v575_v35, %v498_v34  ;;  %v587_v43 = vsel %vm579_vm2, %v570_v27, %v583_v36 }
 0x170   : > { %v599_v39 = vmul.f32 %v865_v31, %v590_v33 }
 0x171   : > { %v588_v40 = vsel %vm580_vm1, %v574_v32, %v584_v37  ;;  %v585_v44 = vmul.f32 0.2, %v576_v38  ;;  %vm581_vm3 = vcmp.gt.f32.partialorder %v576_v38, 0.0 }
 0x172   : > { %v601_v41 = vadd.f32 %v599_v39, %v1497_v3  ;;  %v591_v42 = vadd.f32 1.0, %v588_v40 }
 0x173   : > { %v589_v49 = vsel %vm581_vm3, %v576_v38, %v585_v44 }
 0x174   : > { %v603_v45 = vadd.f32 %v601_v41, %v587_v43  ;;  %v600_v46 = vmul.f32 %v865_v31, %v591_v42 }
 0x176   : > { %v602_v47 = vadd.f32 %v600_v46, %v1509_v6  ;;  %v605_v48 = vsub.f32 %v603_v45, %v1493_v2 }
 0x178   : > { %v604_v50 = vadd.f32 %v602_v47, %v589_v49  ;;  %v607_v51 = vmul.f32 %v605_v48, %v605_v48 }
 0x17a   : > { %v606_v52 = vsub.f32 %v604_v50, %v1505_v5  ;;  %924 = vmatprep.mubr.f32.mxu0 %v607_v51 }
 0x17c   : > { %v608_v53 = vmul.f32 %v606_v52, %v606_v52 }
 0x17e   : > { %925 = vmatmul.mubr.f32.vlgmr.msra.gmra.mxu0 %v608_v53 }
 0x23e   : > { %v926_v54 = vpop.f32.mrf.mxu0 }
 0x23f   : > { %v701_v55 = vmax.f32 %v926_v54, 1e-24 }
 0x240   : > { %v691_v56 = vpop.f32.mrf.mxu0 }
 0x241   : > { %1016 = vrsqrt.f32 %v701_v55  ;;  %v700_v57 = vmax.f32 %v691_v56, 1e-24 }
 0x243   : > { %1018 = vrsqrt.f32 %v700_v57 }
 0x24e   : > { %v1017_v58 = vpop.eup %1016 }
 0x24f   : > { %v705_v59 = vmul.f32 %v1017_v58, %v606_v52 }
 0x250   : > { %v1019_v60 = vpop.eup %1018 }
 0x251   : > { %v704_v61 = vmul.f32 %v1019_v60, %v605_v48  ;;  %707 = vst [vmem:[%s352_s14 + $0x8] sm:$0xff] %v705_v59 }
 0x253   : > { %706 = vst [vmem:[%s352_s14] sm:$0xff] %v704_v61 }
 0x254   : > { %1167 = shalt.err (!%p1164_p13)
}
 0x255   : > { %s1168_s19 = scalar_lea.hbm %s1525_s17, 256  ;;  %s1172_s10 = scalar_lea.hbm %s1576_s6, 512 }
 0x256   : > { %p1169_p6 = scmp.ne.s32.totalorder %s1525_s17, %s1168_s19  ;;  %p1173_p11 = scmp.lt.s32.totalorder %s1525_s17, %s1576_s6 }
 0x257   : > { %p1174_p4 = scmp.lt.s32.totalorder %s1172_s10, %s1168_s19 }
 0x258   : > { %p1170_p1 = pnand %p1169_p6, %p1607_p5 }
 0x259   : > { %p1175_p12 = por %p1174_p4, %p1173_p11 }
 0x25a   : > { %p1171_p8 = pneg %p1170_p1 }
 0x25c   : > { %p1176_p0 = pnand %p1175_p12, %p1171_p8 }
 0x25e   : > { %1179 = shalt.err (!%p1176_p0)
}
 0x25f   : > { %s1243_s2 = smov 128   ;;  %s1244_s27 = smov 8  }
 0x260   : > { %943 = dma.vmem_to_hbm [thread:$0]  (%p1607_p5), %s1527_s26, 256, %s1525_s17, %s709_s13, %s1243_s2, %s1243_s2, %s1244_s27  }
 0x261 PF: > { %s737_s3 = sand.u32 1, %s1218_s21   ;;  %p1608_p3 = scmp.ne.s32.totalorder %s1589_s28, 0 }
 0x262   : > { %p1609_p7 = scmp.ge.s32.totalorder %s1230_s24, 2  ;;  %s738_s30 = scalar_lea.sflag [#allocation4], %s737_s3 }
 0x264   : > { %p963_p9 = pnand %p1609_p7, %p1608_p3 }
 0x266   : > { %p964_p2 = pneg %p963_p9 }
 0x268   : > { %1213 = dma.done.wait (%p964_p2), %s738_s30, 256  }
 0x269   : > { %1215 = vsyncadd (%p964_p2), %s738_s30, 4294967040  ;;  %s1610_s14 = sld [smem:[#allocation17_spill]]  ;;  %p23_p10 = scmp.ge.s32.totalorder %s1363_s11, 4  }
 0x26a   : > { %s1611_s21 = smov %s1222_s22  ;;  %s1612_s22 = smov %s1226_s23 }
 0x26b   : > { %s1614_s24 = smov %s1363_s11  ;;  %25 = sbr.rel (!%p23_p10) target bundleno = 13 (0xd), region = 114 }
 0x26f   : > { %s1613_s23 = smov %s1610_s14 }
 0x270   :  { %743 = vsyncpa [#allocation3], 1 }
 0x271   :  { %745 = vsyncpa [#allocation3 + $0x1], 1 }
 0x272   :  { %746 = vsyncpa [#allocation6], 1 }
 0x273   :  { %748 = vsyncpa [#allocation6 + $0x1], 1 }
 0x274   :  { %749 = vsyncpa [#allocation9], 1 }
 0x275   :  { %750 = vsyncpa [#allocation4], 1 }
 0x276   :  { %752 = vsyncpa [#allocation4 + $0x1], 1 }

</bundles_post_ra>
